<compile_context>
chip_gen: v6e
topology: v6e:2x2x1
jax: 0.10.0
libtpu: 0.0.40
codegen_flags: <defaults>
</compile_context>

<pallas_src>
import math
import functools

import jax
import jax.numpy as jnp
import numpy as np
from jax.experimental import pallas as pl
from jax.experimental.pallas import tpu as pltpu


def _pair(v):
    if isinstance(v, (tuple, list)):
        return (int(v[0]), int(v[1]))
    return (int(v), int(v))


def _psp_kernel(x_ref, o_ref, pad_ref, *,
                k_h, k_w, s_h, s_w, out_h, out_w,
                dst_h0, dst_w0, src_h0, src_w0, cp_h, cp_w):
    """One (batch, channel) plane: zero-pad into scratch, separable max-pool."""
    hd = (out_h - 1) * s_h + 1   # number of "dense" window starts along H
    wd = (out_w - 1) * s_w + 1   # ... along W

    # ---- in-kernel zero padding (F.pad default value=0 participates in max) ----
    pad_ref[...] = jnp.zeros_like(pad_ref)
    pad_ref[dst_h0:dst_h0 + cp_h, dst_w0:dst_w0 + cp_w] = (
        x_ref[src_h0:src_h0 + cp_h, src_w0:src_w0 + cp_w].astype(jnp.float32))
    xp = pad_ref[...]                                    # (Hp, Wp) f32

    # ---- stage 1: max over kw (lane axis), contiguous static slices only ----
    wmax = xp[:, 0:wd]
    for kw in range(1, k_w):
        wmax = jnp.maximum(wmax, xp[:, kw:kw + wd])      # (Hp, wd)

    # ---- stride-s_w subsample along lanes via a 0/1 selection matmul ----
    if s_w > 1:
        r = jax.lax.broadcasted_iota(jnp.int32, (wd, out_w), 0)
        c = jax.lax.broadcasted_iota(jnp.int32, (wd, out_w), 1)
        sel_w = (r == c * s_w).astype(jnp.float32)       # sel_w[k, j] = (k == s_w*j)
        wmax = jnp.dot(wmax, sel_w,
                       preferred_element_type=jnp.float32,
                       precision=jax.lax.Precision.HIGHEST)   # (Hp, out_w)

    # ---- stage 2: max over kh (sublane axis) ----
    hmax = wmax[0:hd, :]
    for kh in range(1, k_h):
        hmax = jnp.maximum(hmax, wmax[kh:kh + hd, :])    # (hd, out_w)

    # ---- stride-s_h subsample along sublanes via a 0/1 selection matmul ----
    if s_h > 1:
        r = jax.lax.broadcasted_iota(jnp.int32, (out_h, hd), 1)
        c = jax.lax.broadcasted_iota(jnp.int32, (out_h, hd), 0)
        sel_h = (r == c * s_h).astype(jnp.float32)       # sel_h[i, k] = (k == s_h*i)
        hmax = jnp.dot(sel_h, hmax,
                       preferred_element_type=jnp.float32,
                       precision=jax.lax.Precision.HIGHEST)   # (out_h, out_w)

    o_ref[...] = hmax.astype(o_ref.dtype)


def psp_forward(x_nchw, kernel_size, stride=None):
    """Forward pass of the PyTorch PSP module (pad + MaxPool2d), NCHW in/out."""
    k_h, k_w = _pair(kernel_size)
    # nn.MaxPool2d: stride defaults to kernel_size.
    s_h, s_w = _pair(kernel_size if stride is None else stride)

    n, c, h, w = x_nchw.shape
    out_h = int(math.ceil(h / s_h))
    out_w = int(math.ceil(w / s_w))
    pad_h = (out_h - 1) * s_h - h + k_h
    pad_w = (out_w - 1) * s_w - w + k_w
    ph_t = pad_h // 2            # may be negative -> crop, exactly like F.pad
    pw_l = pad_w // 2
    hp = h + pad_h               # = (out_h - 1) * s_h + k_h
    wp = w + pad_w               # = (out_w - 1) * s_w + k_w

    # Static copy region into the padded scratch (handles negative pads too).
    dst_h0 = max(0, ph_t)
    dst_w0 = max(0, pw_l)
    src_h0 = dst_h0 - ph_t
    src_w0 = dst_w0 - pw_l
    cp_h = min(hp, ph_t + h) - dst_h0
    cp_w = min(wp, pw_l + w) - dst_w0

    kernel = functools.partial(
        _psp_kernel,
        k_h=k_h, k_w=k_w, s_h=s_h, s_w=s_w, out_h=out_h, out_w=out_w,
        dst_h0=dst_h0, dst_w0=dst_w0, src_h0=src_h0, src_w0=src_w0,
        cp_h=cp_h, cp_w=cp_w)

    return pl.pallas_call(
        kernel,
        out_shape=jax.ShapeDtypeStruct((n, c, out_h, out_w), x_nchw.dtype),
        grid=(n, c),
        in_specs=[pl.BlockSpec((None, None, h, w), lambda i, j: (i, j, 0, 0))],
        out_specs=pl.BlockSpec((None, None, out_h, out_w),
                               lambda i, j: (i, j, 0, 0)),
        scratch_shapes=[pltpu.VMEM((hp, wp), jnp.float32)],
        compiler_params=pltpu.CompilerParams(
            dimension_semantics=("parallel", "parallel")),
    )(x_nchw)


def _reference_psp(x_nchw, kernel_size, stride=None):
    """NumPy reference replicating the PyTorch module exactly."""
    k_h, k_w = _pair(kernel_size)
    s_h, s_w = _pair(kernel_size if stride is None else stride)
    x = np.asarray(x_nchw)
    n, c, h, w = x.shape
    pad_w = (math.ceil(w / s_w) - 1) * s_w - w + k_w
    pad_h = (math.ceil(h / s_h) - 1) * s_h - h + k_h
    xp = np.pad(
        x,
        ((0, 0), (0, 0),
         (pad_h // 2, pad_h - pad_h // 2),
         (pad_w // 2, pad_w - pad_w // 2)),
        mode="constant",
        constant_values=0,
    )
    hp, wp = xp.shape[-2:]
    out_h = (hp - k_h) // s_h + 1
    out_w = (wp - k_w) // s_w + 1
    out = np.empty((n, c, out_h, out_w), dtype=x.dtype)
    for i in range(out_h):
        for j in range(out_w):
            win = xp[:, :, i * s_h:i * s_h + k_h, j * s_w:j * s_w + k_w]
            out[:, :, i, j] = win.max(axis=(-2, -1))
    return out


if __name__ == "__main__":
    # PSP(kernel_size=3, stride=2) on a small NCHW input.
    key = jax.random.PRNGKey(0)
    x = jax.random.normal(key, (2, 4, 16, 16), dtype=jnp.float32)

    y = psp_forward(x, kernel_size=3, stride=2)
    y = jax.block_until_ready(y)

    y_ref = _reference_psp(np.asarray(x), kernel_size=3, stride=2)
    np.testing.assert_allclose(np.asarray(y), y_ref, rtol=1e-5, atol=1e-5)

    print("KERNEL_OK")
</pallas_src>

<mosaic_0001>
module attributes {stable_mosaic.version = 11 : i64} {
  func.func @_psp_kernel(%arg0: i32, %arg1: i32, %arg2: memref<1x1x16x16xf32, #tpu.memory_space<vmem>>, %arg3: memref<1x1x8x8xf32, #tpu.memory_space<vmem>>, %arg4: memref<17x17xf32, #tpu.memory_space<vmem>>) attributes {dimension_semantics = [#tpu.dimension_semantics<parallel>, #tpu.dimension_semantics<parallel>], iteration_bounds = array<i64: 2, 4>, scalar_prefetch = 0 : i64, scratch_operands = 1 : i64, tpu.core_type = #tpu.core_type<tc>, window_params = [{transform_indices = @transform_0, window_bounds = array<i64: 1, 1, 16, 16>}, {transform_indices = @transform_1, window_bounds = array<i64: 1, 1, 8, 8>}]} {
    %cst = arith.constant 0.000000e+00 : f32
    %0 = vector.broadcast %cst : f32 to vector<17x17xf32>
    %c0 = arith.constant 0 : index
    %c0_0 = arith.constant 0 : index
    %1 = vector.load %arg4[%c0, %c0_0] : memref<17x17xf32, #tpu.memory_space<vmem>>, vector<17x17xf32>
    tpu.vector_store %arg4[%c0, %c0_0], %0 {strides = array<i32>} : memref<17x17xf32, #tpu.memory_space<vmem>>, vector<17x17xf32>,
    %c0_1 = arith.constant 0 : index
    %c0_2 = arith.constant 0 : index
    %c0_3 = arith.constant 0 : index
    %c0_4 = arith.constant 0 : index
    %2 = vector.load %arg2[%c0_1, %c0_2, %c0_3, %c0_4] : memref<1x1x16x16xf32, #tpu.memory_space<vmem>>, vector<1x1x16x16xf32>
    %3 = vector.shape_cast %2 : vector<1x1x16x16xf32> to vector<16x16xf32>
    %c0_5 = arith.constant 0 : index
    %c0_6 = arith.constant 0 : index
    %4 = vector.load %arg4[%c0_5, %c0_6] : memref<17x17xf32, #tpu.memory_space<vmem>>, vector<16x16xf32>
    tpu.vector_store %arg4[%c0_5, %c0_6], %3 {strides = array<i32>} : memref<17x17xf32, #tpu.memory_space<vmem>>, vector<16x16xf32>,
    %c0_7 = arith.constant 0 : index
    %c0_8 = arith.constant 0 : index
    %5 = vector.load %arg4[%c0_7, %c0_8] : memref<17x17xf32, #tpu.memory_space<vmem>>, vector<17x17xf32>
    %6 = vector.extract_strided_slice %5 {offsets = [0, 0], sizes = [17, 15], strides = [1, 1]} : vector<17x17xf32> to vector<17x15xf32>
    %7 = vector.extract_strided_slice %5 {offsets = [0, 1], sizes = [17, 15], strides = [1, 1]} : vector<17x17xf32> to vector<17x15xf32>
    %8 = arith.maximumf %6, %7 : vector<17x15xf32>
    %9 = vector.extract_strided_slice %5 {offsets = [0, 2], sizes = [17, 15], strides = [1, 1]} : vector<17x17xf32> to vector<17x15xf32>
    %10 = arith.maximumf %8, %9 : vector<17x15xf32>
    %11 = tpu.iota {dimensions = array<i32: 0>} : vector<15x8xi32>
    %12 = tpu.iota {dimensions = array<i32: 1>} : vector<15x8xi32>
    %c2_i32 = arith.constant 2 : i32
    %13 = vector.broadcast %c2_i32 : i32 to vector<15x8xi32>
    %14 = arith.muli %12, %13 : vector<15x8xi32>
    %15 = arith.cmpi eq, %11, %14 : vector<15x8xi32>
    %16 = arith.extui %15 : vector<15x8xi1> to vector<15x8xi32>
    %17 = arith.sitofp %16 : vector<15x8xi32> to vector<15x8xf32>
    %cst_9 = arith.constant dense<0.000000e+00> : vector<17x8xf32>
    %18 = tpu.matmul %10, %17, %cst_9 {dimension_numbers = #tpu.dot_dimension_numbers<[1], [0], [0], [1], [0, 0, 1, 1], [], []>, precision = #tpu.contract_precision<fp32>} : vector<17x15xf32>, vector<15x8xf32>, vector<17x8xf32> -> vector<17x8xf32>
    %19 = vector.extract_strided_slice %18 {offsets = [0, 0], sizes = [15, 8], strides = [1, 1]} : vector<17x8xf32> to vector<15x8xf32>
    %20 = vector.extract_strided_slice %18 {offsets = [1, 0], sizes = [15, 8], strides = [1, 1]} : vector<17x8xf32> to vector<15x8xf32>
    %21 = arith.maximumf %19, %20 : vector<15x8xf32>
    %22 = vector.extract_strided_slice %18 {offsets = [2, 0], sizes = [15, 8], strides = [1, 1]} : vector<17x8xf32> to vector<15x8xf32>
    %23 = arith.maximumf %21, %22 : vector<15x8xf32>
    %24 = tpu.iota {dimensions = array<i32: 1>} : vector<8x15xi32>
    %25 = tpu.iota {dimensions = array<i32: 0>} : vector<8x15xi32>
    %c2_i32_10 = arith.constant 2 : i32
    %26 = vector.broadcast %c2_i32_10 : i32 to vector<8x15xi32>
    %27 = arith.muli %25, %26 : vector<8x15xi32>
    %28 = arith.cmpi eq, %24, %27 : vector<8x15xi32>
    %29 = arith.extui %28 : vector<8x15xi1> to vector<8x15xi32>
    %30 = arith.sitofp %29 : vector<8x15xi32> to vector<8x15xf32>
    %cst_11 = arith.constant dense<0.000000e+00> : vector<8x8xf32>
    %31 = tpu.matmul %30, %23, %cst_11 {dimension_numbers = #tpu.dot_dimension_numbers<[1], [0], [0], [1], [0, 0, 1, 1], [], []>, precision = #tpu.contract_precision<fp32>} : vector<8x15xf32>, vector<15x8xf32>, vector<8x8xf32> -> vector<8x8xf32>
    %c0_12 = arith.constant 0 : index
    %c0_13 = arith.constant 0 : index
    %c0_14 = arith.constant 0 : index
    %c0_15 = arith.constant 0 : index
    %32 = vector.load %arg3[%c0_12, %c0_13, %c0_14, %c0_15] : memref<1x1x8x8xf32, #tpu.memory_space<vmem>>, vector<1x1x8x8xf32>
    %33 = vector.shape_cast %32 : vector<1x1x8x8xf32> to vector<8x8xf32>
    %34 = vector.shape_cast %31 : vector<8x8xf32> to vector<1x1x8x8xf32>
    tpu.vector_store %arg3[%c0_12, %c0_13, %c0_14, %c0_15], %34 {strides = array<i32>} : memref<1x1x8x8xf32, #tpu.memory_space<vmem>>, vector<1x1x8x8xf32>,
    return
  }
  func.func @transform_0(%arg0: i32, %arg1: i32) -> (i32, i32, i32, i32) {
    %c0_i32 = arith.constant 0 : i32
    %c0_i32_0 = arith.constant 0 : i32
    %c0_i32_1 = arith.constant 0 : i32
    return %arg0, %arg1, %c0_i32, %c0_i32_0 : i32, i32, i32, i32
  }
  func.func @transform_1(%arg0: i32, %arg1: i32) -> (i32, i32, i32, i32) {
    %c0_i32 = arith.constant 0 : i32
    %c0_i32_0 = arith.constant 0 : i32
    %c0_i32_1 = arith.constant 0 : i32
    return %arg0, %arg1, %c0_i32, %c0_i32_0 : i32, i32, i32, i32
  }
}

</mosaic_0001>

<bundles_post_ra>
// kernel: tpu_custom_call.1
= control target key start
LH: loop header
LB: loop body
LE: loop exit
PB: predicated region body
PF: predicated region fallthrough
CT: control target
= control target key end

     0   :  { %6 = vsyncpa [#allocation4], 0  ;;  %s2096_s0 = inlined_call_operand.hbm [shape: f32[2,4,16,16], index: 0, kind: input, shape index: {}]   ;;  %s2097_s1 = inlined_call_operand.hbm [shape: f32[2,4,8,8], index: 1, kind: output, shape index: {}]  }
   0x1   :  { %8 = vsyncpa [#allocation4 + $0x1], 0 }
   0x2   :  { %9 = vsyncpa [#allocation5], 0 }
   0x3   :  { %11 = vsyncpa [#allocation5 + $0x1], 0  ;;  %s1783_s6 = smov 0   ;;  %s1785_s7 = smov 0  }
   0x4   :  { %s1787_s8 = smov 0   ;;  %s1789_s9 = smov 0  }
   0x5   :  { %s1791_s10 = smov 0   ;;  %s1793_s11 = smov 0  }
   0x6   :  { %s1795_s12 = smov 0   ;;  %s1797_s13 = smov 0  }
   0x7 LB: > { %s1357_s14 = sadd.s32 4294967295, %s1762_s13   ;;  %s1358_s15 = sadd.s32 4294967294, %s1762_s13   ;;  %s1762_s13 = sphi %s1797_s13, %s17_s13   ;;  %s1758_s12 = sphi %s1795_s12, %s2113_s12   ;;  %s1754_s11 = sphi %s1793_s11, %s2112_s11   ;;  %s1750_s10 = sphi %s1791_s10, %s2111_s10   ;;  %s1746_s9 = sphi %s1789_s9, %s2110_s9   ;;  %s1742_s8 = sphi %s1787_s8, %s2109_s8   ;;  %s1738_s7 = sphi %s1785_s7, %s2108_s7   ;;  %s1734_s6 = sphi %s1783_s6, %s2107_s6  }
   0x8   : > { %s26_s16 = sadd.s32 1, %s1754_s11  ;;  %s29_s17 = sadd.s32 1, %s1758_s12 }
   0x9   : > { %p27_p0 = scmp.ge.s32.totalorder %s26_s16, 4  ;;  %s38_s18 = sadd.s32 1, %s1742_s8 }
   0xa   : > { %p45_p1 = scmp.ne.s32.totalorder %s1742_s8, %s1738_s7  ;;  %p46_p2 = scmp.eq.s32.totalorder %s1762_s13, 0 }
   0xb   : > { %s2115_s16 = smov (%p27_p0, %s26_s16), 0  ;;  %s2117_s17 = smov (!%p27_p0, %s29_s17), %s1758_s12 }
   0xc   : > { %s34_s19 = ssub.s32 %s1754_s11, %s2115_s16  ;;  %p1836_p3 = por %p46_p2, %p45_p1 }
   0xd   : > { %p31_p4 = scmp.ge.s32.totalorder %s2117_s17, 2  ;;  %p51_p5 = scmp.ne.s32.totalorder %s1738_s7, %s1734_s6 }
   0xe   : > { %p52_p6 = scmp.eq.s32.totalorder %s1357_s14, 0  ;;  %p77_p7 = scmp.eq.s32.totalorder %s1357_s14, 7 }
   0xf   : > { %s2119_s17 = smov (%p31_p4, %s2117_s17), 0  ;;  %p83_p10 = scmp.eq.s32.totalorder %s1358_s15, 7 }
  0x10   : > { %p1844_p8 = por %p52_p6, %p51_p5  ;;  %p1848_p9 = por %p77_p7, %p45_p1 }
  0x11   : > { %s33_s23 = ssub.s32 %s1758_s12, %s2119_s17  ;;  %p1854_p12 = por %p83_p10, %p51_p5 }
  0x12   : > { %s35_s24 = sor.u32 %s34_s19, %s33_s23  ;;  %p1565_p13 = scmp.lt.s32.totalorder %s1762_s13, 8 }
  0x13   : > { %p36_p11 = scmp.eq.s32.totalorder %s35_s24, 0  ;;  %s103_s26 = sand.u32 1, %s1742_s8  }
  0x14   : > { %s1361_s28 = sshll.u32 %s103_s26, 4  ;;  %s1362_s29 = sshll.u32 %s1754_s11, 1 }
  0x15   : > { %s1861_s27 = scalar_select %p36_p11, %s1742_s8, %s38_s18  }
  0x16   : > { %s1363_s30 = sshll.u32 %s1758_s12, 3  ;;  %s107_s2 = scalar_lea.vmem [#allocation3], %s1361_s28 }
  0x17   : > { %s116_s3 = sshll.u32 %s107_s2, 4  ;;  %s113_s4 = sadd.s32 %s1363_s30, %s1362_s29  ;;  %s117_s3 = int_to_ptr.vmem [resolvable:$true] %s116_s3 }
  0x18   : > { %s1364_s5 = sshll.u32 %s113_s4, 7  ;;  %p1867_p0 = pnand %p1565_p13, %p1836_p3 }
  0x19   : > { %s115_s23 = scalar_lea.hbm %s2096_s0, %s1364_s5  ;;  %s104_s18 = scalar_lea.sflag [#allocation4], %s103_s26 }
  0x1a   : > { %p1640_p1 = pneg %p1867_p0  ;;  %s1651_s24 = scalar_lea.vmem %s117_s3, 256 }
  0x1b   : > { %p1652_p2 = scmp.ne.s32.totalorder %s117_s3, %s1651_s24  ;;  %s1764_s28 = smov [#allocation3]  }
  0x1c   : > { %s1656_s29 = sshll.u32 %s1764_s28, 4  ;;  %s1657_s29 = int_to_ptr.vmem [resolvable:$false] %s1656_s29 }
  0x1d   : > { %p1654_p4 = pnand %p1652_p2, %p1640_p1  ;;  %s1658_s20 = scalar_lea.vmem %s1657_s29, 512 }
  0x1e   : > { %p1659_p3 = scmp.lt.s32.totalorder %s117_s3, %s1657_s29  ;;  %p1660_p6 = scmp.lt.s32.totalorder %s1658_s20, %s1651_s24 }
  0x1f   : > { %p1655_p5 = pneg %p1654_p4 }
  0x20   : > { %p1661_p7 = por %p1660_p6, %p1659_p3 }
  0x22   : > { %p1662_p10 = pnand %p1661_p7, %p1655_p5 }
  0x24   : > { %1665 = shalt.err (!%p1662_p10)
}
  0x25   : > { %s1765_s30 = smov 128   ;;  %s1766_s26 = smov 8  }
  0x26   : > { %1560 = dma.hbm_to_vmem [thread:$0]  (!%p1867_p0), %s115_s23, 256, %s117_s3, %s104_s18, %s1765_s30, %s1765_s30, %s1766_s26  }
  0x27   : > { %p1365_p11 = scmp.ge.s32.totalorder %s1762_s13, 1  ;;  %p124_p13 = scmp.lt.s32.totalorder %s1762_s13, 9 }
  0x29   : > { %p125_p1 = pnand %p1365_p11, %p124_p13 }
  0x2a   : > { %s1881_s2 = sand.u32 (!%p125_p1), 1, %s1738_s7  }
  0x2b   : > { %128 = sbr.rel (%p125_p1) target bundleno = 656 (0x290), region = 24  ;;  %s1366_s4 = sshll.u32 (!%p125_p1), %s1881_s2, 4 }
  0x2c   : > { %s131_s5 = scalar_lea.sflag (!%p125_p1), [#allocation4], %s1881_s2  ;;  %s134_s15 = scalar_lea.vmem (!%p125_p1), [#allocation3], %s1366_s4 }
  0x30   : > { %1725 = dma.done.wait (%p1844_p8), %s131_s5, 256  }
  0x31   : > { %1727 = vsyncadd (%p1844_p8), %s131_s5, 4294967040  ;;  %vm153_vm0 = vcmask 138240   ;;  %v193_v0 = vlaneseq  ;;  %v1767_v1 = vmov 0.0   ;;  %vm156_vm1 = vcmask 131072   ;;  %v159_v7 = vld [vmem:[%s134_s15 + $0x8] sm:$0xff]  ;;  %v158_v8 = vld [vmem:[%s134_s15] sm:$0xff] }
  0x32   : > { %154 = vst.msk [vmem:[#allocation2] sm:$0xff] %vm153_vm0, %v1767_v1  ;;  %155 = vst.msk [vmem:[#allocation2 + $0x8] sm:$0xff] %vm153_vm0, %v1767_v1  ;;  %1446 = vmatprep.subr.mxu1 %v1767_v1  ;;  %1433 = vmatprep.subr.mxu0 %v1767_v1  ;;  %vm160_vm2 = vcmask 130048   ;;  %vm215_vm3 = vcmask 1046528   ;;  %vm1768_vm6 = vmmov 0   ;;  %s1769_s21 = smov 127  }
  0x33   : > { %157 = vst.msk [vmem:[#allocation2 + $0x10] sm:$0x1] %vm156_vm1, %v1767_v1  ;;  %v194_v2 = vshrl.u32 %v193_v0, 7  ;;  %v197_v3 = vand.u32 127, %v193_v0  ;;  %1450 = vmatprep.mubr.msk.f32.mxu1 %vm1768_vm6, %v1767_v1  ;;  %1437 = vmatprep.mubr.msk.f32.mxu0 %vm1768_vm6, %v1767_v1  ;;  %v1770_v24 = vmov 1.0   ;;  %s1771_s3 = smov 126  }
  0x34   : > { %162 = vst.msk [vmem:[#allocation2 + $0x8] sm:$0xff] %vm160_vm2, %v159_v7  ;;  %161 = vst.msk [vmem:[#allocation2] sm:$0xff] %vm160_vm2, %v158_v8  ;;  %vm205_vm8 = vcmask 121856   ;;  %vm774_vm9 = vcmask 1045504   ;;  %s1367_s14 = sshll.u32 %s1881_s2, 3  ;;  %s1381_s19 = sshll.u32 %s1750_s10, 2 }
  0x35   : > { %v195_v4 = vadd.s32 8, %v194_v2  ;;  %v198_v5 = vmul.u32 2, %v197_v3  ;;  %v784_v16 = vmul.u32 2, %v194_v2  ;;  %s1267_s23 = sadd.s32 %s1746_s9, %s1381_s19  ;;  %s152_s24 = scalar_lea.vmem [#allocation6], %s1367_s14  ;;  %vm1253_vm10 = vcmask 64512  }
  0x36   : > { %s1382_s18 = sshll.u32 %s1267_s23, 7  ;;  %s1271_s28 = sshll.u32 %s152_s24, 4  ;;  %s1272_s28 = int_to_ptr.vmem [resolvable:$true] %s1271_s28 }
  0x37   : > { %vm200_vm4 = vcmp.eq.s32.totalorder %v195_v4, %v198_v5  ;;  %vm1894_vm5 = vcmp.eq.s32.totalorder %v194_v2, %v198_v5  ;;  %vm1925_vm7 = vcmp.eq.s32.totalorder %v197_v3, %v784_v16  ;;  %s2049_s20 = scalar_lea.hbm %s2097_s1, %s1382_s18  ;;  %s1256_s9 = scalar_lea.sflag [#allocation5], %s1881_s2 }
  0x38   : > { %v1899_v9 = vsel %vm200_vm4, 1.0, %v1767_v1  ;;  %v1368_v10 = vsel %vm1894_vm5, 1.0, %v1767_v1  ;;  %s1666_s30 = scalar_lea.vmem %s1272_s28, 128  ;;  %s1772_s26 = smov [#allocation6]  }
  0x39   : > { %v217_v11 = vsel %vm215_vm3, %v1899_v9, 0  ;;  %v1906_v12 = vsub.f32 %v1368_v10, %v1368_v10  ;;  %1434 = vmatpush3.msk.msra.mxu0 %vm215_vm3, %v1899_v9  ;;  %p1667_p8 = scmp.ne.s32.totalorder %s1272_s28, %s1666_s30  ;;  %s1670_s4 = sshll.u32 %s1772_s26, 4  ;;  %s1671_s4 = int_to_ptr.vmem [resolvable:$false] %s1670_s4 }
  0x3a   : > { %v1910_v13 = vsub.f32 %v217_v11, %v217_v11  ;;  %1435 = vmatprep.subr.mxu0 %v1767_v1  ;;  %v165_v25 = vld [vmem:[#allocation2 + $0x10] sm:$0x1]  ;;  %s1672_s5 = scalar_lea.vmem %s1671_s4, 256  ;;  %p1673_p4 = scmp.lt.s32.totalorder %s1272_s28, %s1671_s4 }
  0x3b   : > { %v354_v14 = vand.u32 4294901760, %v1906_v12  ;;  %v164_v20 = vld [vmem:[#allocation2 + $0x8] sm:$0xff]  ;;  %v163_v21 = vld [vmem:[#allocation2] sm:$0xff]  ;;  %1436 = vmatpush3.msk.msra.mxu0 %vm1894_vm5, %v1770_v24  ;;  %p1668_p0 = pnand %p1667_p8, %p1848_p9  ;;  %p1674_p5 = scmp.lt.s32.totalorder %s1672_s5, %s1666_s30 }
  0x3c   : > { %v347_v15 = vand.u32 4294901760, %v1910_v13  ;;  %171 = vrot.lane.b32.xlu1 %v164_v20, %s1769_s21  ;;  %169 = vrot.lane.b32.xlu0 %v163_v21, %s1769_s21 }
  0x3d   : > { %v355_v17 = vsub.f32 %v1906_v12, %v354_v14  ;;  %1459 = vmatprep.subr.mxu0 %v1767_v1  ;;  %p1669_p2 = pneg %p1668_p0  ;;  %p1675_p3 = por %p1674_p5, %p1673_p4 }
  0x3e   : > { %v348_v18 = vsub.f32 %v1910_v13, %v347_v15 }
  0x3f   : > { %v356_v23 = vand.u32 4294901760, %v355_v17  ;;  %p1676_p6 = pnand %p1675_p3, %p1669_p2 }
  0x40   : > { %v349_v22 = vand.u32 4294901760, %v348_v18  ;;  %183 = vrot.lane.b32.xlu1 %v164_v20, %s1771_s3  ;;  %181 = vrot.lane.b32.xlu0 %v163_v21, %s1771_s3 }
  0x42   : > { %1447 = vmatpush3.msra.mxu1 %v349_v22 }
  0x43   : > { %1448 = vmatprep.subr.mxu1 %v1767_v1 }
  0x44   : > { %1449 = vmatpush3.msra.mxu1 %v356_v23  ;;  %173 = vrot.lane.b32.xlu0 %v165_v25, %s1769_s21 }
  0x45   : > { %1472 = vmatprep.subr.mxu1 %v1767_v1  ;;  %185 = vrot.lane.b32.xlu1 %v165_v25, %s1771_s3 }
  0xae   : > { %v172_v26 = vpop.permute.xlu1 %171  ;;  %v170_v27 = vpop.permute.xlu0 %169 }
  0xaf   : > { %v179_v28 = vmax.f32 %v164_v20, %v172_v26  ;;  %v178_v29 = vmax.f32 %v163_v21, %v170_v27 }
  0xb2   : > { %v184_v30 = vpop.permute.xlu1 %183  ;;  %v182_v31 = vpop.permute.xlu0 %181 }
  0xb3   : > { %v191_v32 = vmax.f32 %v179_v28, %v184_v30  ;;  %v190_v33 = vmax.f32 %v178_v29, %v182_v31  ;;  %v2013_v31 = vsel %vm1925_vm7, 1.0, %v1767_v1 }
  0xb5   : > { %v210_v34 = vsel %vm205_vm8, %v191_v32, 0  ;;  %v207_v35 = vsel %vm205_vm8, %v190_v33, 0 }
  0xb6   : > { %v1937_v36 = vand.u32 4294901760, %v210_v34  ;;  %v1939_v37 = vand.u32 4294901760, %v207_v35  ;;  %v174_v38 = vpop.permute.xlu0 %173 }
  0xb7   : > { %v186_v39 = vpop.permute.xlu1 %185  ;;  %v180_v40 = vmax.f32 %v165_v25, %v174_v38 }
  0xb8   : > { %v297_v41 = vsub.f32 %v210_v34, %v1937_v36  ;;  %v287_v42 = vsub.f32 %v207_v35, %v1939_v37  ;;  %1451 = vmatmul.mubr.f32.vlgmr.msra.gmra.mxu1 %v1939_v37 }
  0xb9   : > { %v192_v43 = vmax.f32 %v180_v40, %v186_v39  ;;  %1453 = vmatprep.mubr.msk.f32.mxu1 %vm1768_vm6, %v1767_v1  ;;  %1473 = vmatpush3.msk.msra.mxu1 %vm215_vm3, %v1899_v9  ;;  %v789_v39 = vsel %vm205_vm8, %v2013_v31, 0 }
  0xba   : > { %v288_v44 = vand.u32 4294901760, %v287_v42  ;;  %1474 = vmatprep.subr.mxu1 %v1767_v1  ;;  %v298_v45 = vand.u32 4294901760, %v297_v41 }
  0xbb   : > { %v213_v46 = vsel %vm205_vm8, %v192_v43, 0  ;;  %1475 = vmatpush3.msk.msra.mxu1 %vm1894_vm5, %v1770_v24 }
  0xbc   : > { %v306_v47 = vand.u32 4294901760, %v213_v46  ;;  %1454 = vmatmul.mubr.f32.gmra.mxu1 %v1937_v36  ;;  %v289_v48 = vsub.f32 %v287_v42, %v288_v44  ;;  %1498 = vmatprep.subr.mxu1 %v1767_v1  ;;  %v299_v51 = vsub.f32 %v297_v41, %v298_v45 }
  0xbd   : > { %1456 = vmatprep.mubr.msk.f32.mxu1 %vm1768_vm6, %v1767_v1 }
  0xbe   : > { %v307_v49 = vsub.f32 %v213_v46, %v306_v47  ;;  %v290_v50 = vand.u32 4294901760, %v289_v48  ;;  %v300_v53 = vand.u32 4294901760, %v299_v51 }
  0xc0   : > { %1438 = vmatmul.mubr.f32.vlgmr.msra.gmra.mxu0 %v290_v50  ;;  %1457 = vmatmul.mubr.f32.gmra.mxu1 %v306_v47  ;;  %v308_v52 = vand.u32 4294901760, %v307_v49 }
  0xc1   : > { %1440 = vmatprep.mubr.msk.f32.mxu0 %vm1768_vm6, %v1767_v1  ;;  %1476 = vmatprep.mubr.msk.f32.mxu1 %vm1768_vm6, %v1767_v1 }
  0xc2   : > { %v309_v54 = vsub.f32 %v307_v49, %v308_v52  ;;  %1460 = vmatpush3.msra.mxu0 %v1910_v13 }
  0xc3   : > { %1461 = vmatprep.subr.mxu0 %v1767_v1 }
  0xc4   : > { %1441 = vmatmul.mubr.f32.gmra.mxu0 %v300_v53  ;;  %1477 = vmatmul.mubr.f32.vlgmr.msra.gmra.mxu1 %v288_v44  ;;  %v310_v55 = vand.u32 4294901760, %v309_v54  ;;  %v862_v44 = vsub.f32 %v789_v39, %v789_v39 }
  0xc5   : > { %1443 = vmatprep.mubr.msk.f32.mxu0 %vm1768_vm6, %v1767_v1  ;;  %1479 = vmatprep.mubr.msk.f32.mxu1 %vm1768_vm6, %v1767_v1 }
  0xc6   : > { %1462 = vmatpush3.msra.mxu0 %v1906_v12  ;;  %1499 = vmatpush3.msk.msra.mxu1 %vm215_vm3, %v1899_v9  ;;  %v863_v53 = vand.u32 4294901760, %v862_v44 }
  0xc7   : > { %1500 = vmatprep.subr.mxu1 %v1767_v1  ;;  %1485 = vmatprep.subr.mxu0 %v1767_v1 }
  0xc8   : > { %1444 = vmatmul.mubr.f32.gmra.mxu0 %v310_v55  ;;  %1480 = vmatmul.mubr.f32.gmra.mxu1 %v298_v45 }
  0xc9   : > { %1463 = vmatprep.mubr.msk.f32.mxu0 %vm1768_vm6, %v1767_v1  ;;  %1482 = vmatprep.mubr.msk.f32.mxu1 %vm1768_vm6, %v1767_v1 }
  0xca   : > { %1501 = vmatpush3.msk.msra.mxu1 %vm1894_vm5, %v1770_v24 }
  0xcb   : > { %1518 = vmatprep.subr.mxu1 %v1767_v1 }
  0xcc   : > { %1464 = vmatmul.mubr.f32.vlgmr.msra.gmra.mxu0 %v287_v42  ;;  %1483 = vmatmul.mubr.f32.gmra.mxu1 %v308_v52 }
  0xcd   : > { %1466 = vmatprep.mubr.msk.f32.mxu0 %vm1768_vm6, %v1767_v1  ;;  %1502 = vmatprep.mubr.msk.f32.mxu1 %vm1768_vm6, %v1767_v1 }
  0xce   : > { %1486 = vmatpush3.msra.mxu0 %v347_v15 }
  0xcf   : > { %1487 = vmatprep.subr.mxu0 %v1767_v1 }
  0xd0   : > { %1467 = vmatmul.mubr.f32.gmra.mxu0 %v297_v41  ;;  %1503 = vmatmul.mubr.f32.vlgmr.msra.gmra.mxu1 %v1939_v37 }
  0xd1   : > { %1469 = vmatprep.mubr.msk.f32.mxu0 %vm1768_vm6, %v1767_v1  ;;  %1505 = vmatprep.mubr.msk.f32.mxu1 %vm1768_vm6, %v1767_v1 }
  0xd2   : > { %1488 = vmatpush3.msra.mxu0 %v354_v14 }
  0xd3   : > { %1511 = vmatprep.subr.mxu0 %v1767_v1 }
  0xd4   : > { %1470 = vmatmul.mubr.f32.gmra.mxu0 %v307_v49  ;;  %1506 = vmatmul.mubr.f32.gmra.mxu1 %v1937_v36 }
  0xd5   : > { %1489 = vmatprep.mubr.msk.f32.mxu0 %vm1768_vm6, %v1767_v1  ;;  %1508 = vmatprep.mubr.msk.f32.mxu1 %vm1768_vm6, %v1767_v1 }
  0xd8   : > { %1490 = vmatmul.mubr.f32.vlgmr.msra.gmra.mxu0 %v1939_v37  ;;  %1509 = vmatmul.mubr.f32.gmra.mxu1 %v306_v47 }
  0xd9   : > { %1492 = vmatprep.mubr.msk.f32.mxu0 %vm1768_vm6, %v1767_v1  ;;  %1522 = vmatprep.mubr.msk.f32.mxu1 %vm1768_vm6, %v1767_v1 }
  0xdc   : > { %1493 = vmatmul.mubr.f32.gmra.mxu0 %v1937_v36 }
  0xdd   : > { %1495 = vmatprep.mubr.msk.f32.mxu0 %vm1768_vm6, %v1767_v1 }
  0xe0   : > { %1496 = vmatmul.mubr.f32.gmra.mxu0 %v306_v47 }
  0xe1   : > { %1515 = vmatprep.mubr.msk.f32.mxu0 %vm1768_vm6, %v1767_v1 }
 0x178   : > { %v393_v56 = vpop.f32.mrf.mxu1 }
 0x17a   : > { %v1452_v57 = vpop.f32.mrf.mxu1 }
 0x17c   : > { %v399_v58 = vpop.f32.mrf.mxu1 }
 0x17e   : > { %v1455_v59 = vpop.f32.mrf.mxu1 }
 0x180   : > { %v292_v60 = vpop.f32.mrf.mxu0  ;;  %v405_v61 = vpop.f32.mrf.mxu1 }
 0x181   : > { %v394_v15 = vadd.f32 %v393_v56, %v292_v60 }
 0x182   : > { %v1439_v62 = vpop.f32.mrf.mxu0  ;;  %v1458_v63 = vpop.f32.mrf.mxu1 }
 0x184   : > { %v302_v0 = vpop.f32.mrf.mxu0  ;;  %v570_v2 = vpop.f32.mrf.mxu1 }
 0x185   : > { %v400_v22 = vadd.f32 %v399_v58, %v302_v0 }
 0x186   : > { %v1442_v3 = vpop.f32.mrf.mxu0  ;;  %v1478_v4 = vpop.f32.mrf.mxu1 }
 0x188   : > { %v312_v5 = vpop.f32.mrf.mxu0  ;;  %v578_v6 = vpop.f32.mrf.mxu1 }
 0x189   : > { %v406_v29 = vadd.f32 %v405_v61, %v312_v5  ;;  %v864_v61 = vsub.f32 %v862_v44, %v863_v53 }
 0x18a   : > { %v1445_v7 = vpop.f32.mrf.mxu0  ;;  %v1481_v8 = vpop.f32.mrf.mxu1 }
 0x18c   : > { %v481_v9 = vpop.f32.mrf.mxu0  ;;  %v586_v10 = vpop.f32.mrf.mxu1 }
 0x18d   : > { %v482_v18 = vadd.f32 %v481_v9, %v394_v15 }
 0x18e   : > { %v1465_v11 = vpop.f32.mrf.mxu0  ;;  %v1484_v12 = vpop.f32.mrf.mxu1 }
 0x18f   : > { %v571_v26 = vadd.f32 %v570_v2, %v482_v18  ;;  %v865_v2 = vand.u32 4294901760, %v864_v61 }
 0x190   : > { %v488_v13 = vpop.f32.mrf.mxu0  ;;  %v748_v14 = vpop.f32.mrf.mxu1 }
 0x191   : > { %v489_v25 = vadd.f32 %v488_v13, %v400_v22 }
 0x192   : > { %v1468_v16 = vpop.f32.mrf.mxu0  ;;  %v1504_v17 = vpop.f32.mrf.mxu1 }
 0x193   : > { %v579_v35 = vadd.f32 %v578_v6, %v489_v25 }
 0x194   : > { %v495_v20 = vpop.f32.mrf.mxu0  ;;  %v754_v21 = vpop.f32.mrf.mxu1 }
 0x195   : > { %v496_v34 = vadd.f32 %v495_v20, %v406_v29 }
 0x196   : > { %v1471_v23 = vpop.f32.mrf.mxu0  ;;  %v1507_v24 = vpop.f32.mrf.mxu1 }
 0x197   : > { %v587_v42 = vadd.f32 %v586_v10, %v496_v34 }
 0x198   : > { %v663_v27 = vpop.f32.mrf.mxu0  ;;  %v760_v28 = vpop.f32.mrf.mxu1 }
 0x199   : > { %v664_v30 = vadd.f32 %v663_v27, %v571_v26 }
 0x19a   : > { %v1491_v32 = vpop.f32.mrf.mxu0  ;;  %v1510_v33 = vpop.f32.mrf.mxu1 }
 0x19b   : > { %v749_v37 = vadd.f32 %v748_v14, %v664_v30 }
 0x19c   : > { %v669_v36 = vpop.f32.mrf.mxu0 }
 0x19d   : > { %v670_v38 = vadd.f32 %v669_v36, %v579_v35  ;;  %v766_v45 = vrot.slane %v749_v37, 1  ;;  %v775_v49 = vrot.slane %v749_v37, 2 }
 0x19e   : > { %v1494_v40 = vpop.f32.mrf.mxu0 }
 0x19f   : > { %v755_v41 = vadd.f32 %v754_v21, %v670_v38 }
 0x1a0   : > { %v675_v43 = vpop.f32.mrf.mxu0 }
 0x1a1   : > { %v767_v46 = vrot.slane %v755_v41, 1  ;;  %v776_v19 = vrot.slane %v755_v41, 2  ;;  %v676_v47 = vadd.f32 %v675_v43, %v587_v42 }
 0x1a2   : > { %v1497_v48 = vpop.f32.mrf.mxu0 }
 0x1a3   : > { %v768_v50 = vsel %vm215_vm3, %v766_v45, %v767_v46  ;;  %v761_v51 = vadd.f32 %v760_v28, %v676_v47  ;;  %v777_v55 = vsel %vm774_vm9, %v775_v49, %v776_v19  ;;  %v772_v56 = vmax.f32 %v755_v41, %v767_v46 }
 0x1a4   : > { %v771_v52 = vmax.f32 %v749_v37, %v768_v50 }
 0x1a5   : > { %v778_v54 = vrot.slane %v761_v51, 2 }
 0x1a6   : > { %v782_v57 = vmax.f32 %v771_v52, %v777_v55 }
 0x1a7   : > { %v779_v58 = vsel %vm774_vm9, %v776_v19, %v778_v54 }
 0x1a8   : > { %v783_v59 = vmax.f32 %v772_v56, %v779_v58  ;;  %v826_v60 = vand.u32 4294901760, %v782_v57 }
 0x1aa   : > { %v792_v62 = vsel %vm215_vm3, %v783_v59, 0  ;;  %v908_v63 = vsub.f32 %v782_v57, %v826_v60 }
 0x1ab   : > { %v823_v0 = vand.u32 4294901760, %v792_v62 }
 0x1ac   : > { %v909_v4 = vand.u32 4294901760, %v908_v63 }
 0x1ad   : > { %1512 = vmatpush3.msra.mxu0 %v823_v0  ;;  %v901_v3 = vsub.f32 %v792_v62, %v823_v0 }
 0x1ae   : > { %1513 = vmatprep.subr.mxu0 %v1767_v1  ;;  %v910_v7 = vsub.f32 %v908_v63, %v909_v4 }
 0x1af   : > { %1514 = vmatpush3.msra.mxu0 %v826_v60  ;;  %v902_v5 = vand.u32 4294901760, %v901_v3 }
 0x1b0   : > { %1525 = vmatprep.subr.mxu0 %v1767_v1  ;;  %1516 = vmatmul.mubr.f32.vlgmr.msra.gmra.mxu0 %v865_v2  ;;  %v911_v9 = vand.u32 4294901760, %v910_v7 }
 0x1b1   : > { %1526 = vmatpush3.msra.mxu0 %v901_v3  ;;  %1529 = vmatprep.mubr.msk.f32.mxu0 %vm1768_vm6, %v1767_v1  ;;  %v903_v6 = vsub.f32 %v901_v3, %v902_v5 }
 0x1b2   : > { %1527 = vmatprep.subr.mxu0 %v1767_v1 }
 0x1b3   : > { %1528 = vmatpush3.msra.mxu0 %v908_v63  ;;  %v904_v8 = vand.u32 4294901760, %v903_v6 }
 0x1b4   : > { %1539 = vmatprep.subr.mxu0 %v1767_v1  ;;  %1530 = vmatmul.mubr.f32.vlgmr.msra.gmra.mxu0 %v862_v44 }
 0x1b5   : > { %1519 = vmatpush3.msra.mxu1 %v904_v8  ;;  %1540 = vmatpush3.msra.mxu0 %v902_v5 }
 0x1b6   : > { %1520 = vmatprep.subr.mxu1 %v1767_v1  ;;  %1541 = vmatprep.subr.mxu0 %v1767_v1 }
 0x1b7   : > { %1521 = vmatpush3.msra.mxu1 %v911_v9  ;;  %1542 = vmatpush3.msra.mxu0 %v909_v4 }
 0x1b8   : > { %1532 = vmatprep.subr.mxu1 %v1767_v1  ;;  %1523 = vmatmul.mubr.msk.f32.vlgmr.msra.gmra.mxu1 %vm205_vm8, %v2013_v31 }
 0x1b9   : > { %1533 = vmatpush3.msra.mxu1 %v823_v0  ;;  %1536 = vmatprep.mubr.msk.f32.mxu1 %vm1768_vm6, %v1767_v1 }
 0x1ba   : > { %1534 = vmatprep.subr.mxu1 %v1767_v1  ;;  %1543 = vmatprep.mubr.msk.f32.mxu0 %vm1768_vm6, %v1767_v1 }
 0x1bb   : > { %1535 = vmatpush3.msra.mxu1 %v826_v60  ;;  %1544 = vmatmul.mubr.msk.f32.vlgmr.msra.gmra.mxu0 %vm205_vm8, %v2013_v31 }
 0x1bc   : > { %1546 = vmatprep.subr.mxu1 %v1767_v1  ;;  %1537 = vmatmul.mubr.f32.vlgmr.msra.gmra.mxu1 %v863_v53 }
 0x1bd   : > { %1547 = vmatpush3.msra.mxu1 %v823_v0  ;;  %1550 = vmatprep.mubr.msk.f32.mxu1 %vm1768_vm6, %v1767_v1 }
 0x1be   : > { %1548 = vmatprep.subr.mxu1 %v1767_v1 }
 0x1bf   : > { %1549 = vmatpush3.msra.mxu1 %v826_v60 }
 0x1c0   : > { %1551 = vmatmul.mubr.msk.f32.vlgmr.msra.gmra.mxu1 %vm205_vm8, %v2013_v31 }
 0x270   : > { %v867_v10 = vpop.f32.mrf.mxu0 }
 0x272   : > { %v1517_v11 = vpop.f32.mrf.mxu0 }
 0x274   : > { %v1024_v12 = vpop.f32.mrf.mxu0 }
 0x276   : > { %v1531_v13 = vpop.f32.mrf.mxu0 }
 0x278   : > { %v948_v14 = vpop.f32.mrf.mxu1 }
 0x279   : > { %v949_v15 = vadd.f32 %v948_v14, %v867_v10 }
 0x27a   : > { %v1524_v16 = vpop.f32.mrf.mxu1 }
 0x27b   : > { %v1025_v17 = vadd.f32 %v1024_v12, %v949_v15  ;;  %v1176_v18 = vpop.f32.mrf.mxu0 }
 0x27c   : > { %v1099_v20 = vpop.f32.mrf.mxu1 }
 0x27d   : > { %v1100_v21 = vadd.f32 %v1099_v20, %v1025_v17  ;;  %v1545_v1 = vpop.f32.mrf.mxu0 }
 0x27e   : > { %v1538_v22 = vpop.f32.mrf.mxu1 }
 0x27f   : > { %v1177_v23 = vadd.f32 %v1176_v18, %v1100_v21 }
 0x280   : > { %v1249_v24 = vpop.f32.mrf.mxu1 }
 0x281   : > { %v1250_v25 = vadd.f32 %v1249_v24, %v1177_v23 }
 0x282   : > { %v1552_v26 = vpop.f32.mrf.mxu1 }
 0x283   : > { %1254 = vst.msk [vmem:[%s152_s24] sm:$0xff] %vm1253_vm10, %v1250_v25 }
 0x284   : > { %1679 = shalt.err (!%p1676_p6)
}
 0x285   : > { %s1680_s15 = scalar_lea.hbm %s2049_s20, 128  ;;  %s1684_s3 = scalar_lea.hbm %s2097_s1, 1024 }
 0x286   : > { %p1681_p7 = scmp.ne.s32.totalorder %s2049_s20, %s1680_s15  ;;  %p1685_p13 = scmp.lt.s32.totalorder %s2049_s20, %s2097_s1 }
 0x287   : > { %p1686_p1 = scmp.lt.s32.totalorder %s1684_s3, %s1680_s15 }
 0x288   : > { %p1682_p10 = pnand %p1681_p7, %p1848_p9 }
 0x289   : > { %p1687_p8 = por %p1686_p1, %p1685_p13 }
 0x28a   : > { %p1683_p11 = pneg %p1682_p10 }
 0x28c   : > { %p1688_p0 = pnand %p1687_p8, %p1683_p11 }
 0x28e   : > { %1691 = shalt.err (!%p1688_p0)
}
 0x28f   : > { %1555 = dma.vmem_to_hbm [thread:$0]  (%p1848_p9), %s1272_s28, 128, %s2049_s20, %s1256_s9  }
 0x290 PF: > { %p1566_p2 = scmp.ge.s32.totalorder %s1762_s13, 2  ;;  %s1283_s23 = sand.u32 1, %s1734_s6  }
 0x291   : > { %s1284_s18 = scalar_lea.sflag [#allocation5], %s1283_s23 }
 0x292   : > { %p1562_p4 = pnand %p1566_p2, %p1854_p12 }
 0x294   : > { %p1563_p5 = pneg %p1562_p4 }
 0x296   : > { %1729 = dma.done.wait (%p1563_p5), %s1284_s18, 128  }
 0x297   : > { %1731 = vsyncadd (%p1563_p5), %s1284_s18, 4294967168  ;;  %s17_s13 = sadd.s32 1, %s1762_s13   ;;  %s2107_s6 = smov %s1738_s7 }
 0x298   : > { %p14_p3 = scmp.ge.s32.totalorder %s17_s13, 10   ;;  %s2108_s7 = smov %s1742_s8 }
 0x299   : > { %s2109_s8 = smov %s1861_s27  ;;  %s2110_s9 = smov %s1754_s11 }
 0x29a   : > { %s2111_s10 = smov %s1758_s12  ;;  %s2112_s11 = smov %s2115_s16 }
 0x29b   : > { %s2113_s12 = smov %s2119_s17  ;;  %16 = sbr.rel (!%p14_p3) target bundleno = 7 (0x7), region = 69 }
 0x2a0   :  { %1289 = vsyncpa [#allocation4], 1 }
 0x2a1   :  { %1291 = vsyncpa [#allocation4 + $0x1], 1 }
 0x2a2   :  { %1292 = vsyncpa [#allocation5], 1 }
 0x2a3   :  { %1294 = vsyncpa [#allocation5 + $0x1], 1 }

</bundles_post_ra>
